<compile_context>
chip_gen: v5e
topology: v5e:2x2
jax: 0.10.0
libtpu: 0.0.40
codegen_flags: <defaults>
</compile_context>

<pallas_src>
import jax
import jax.numpy as jnp
from jax.experimental import pallas as pl
from jax.experimental.pallas import tpu as pltpu


def _mlp_kernel(xT_ref, w1_ref, b1_ref, w2_ref, b2_ref, w3_ref, b3_ref, o_ref):
    # xT_ref: [2, TB]      (state, transposed; batch on lanes)
    # w1_ref: [192, 2]     (PyTorch layout W1 [out, in]) , f32
    # b1_ref: [192, 1]     f32
    # w2_ref: [192, 192]   f32 or bf16 (fast path)
    # b2_ref: [192, 1]     f32
    # w3_ref: [192, 1]     (W3^T), f32
    # b3_ref: [1, 1]       f32
    # o_ref : [1, TB]      (lane-dense output)
    xT = xT_ref[...]                                   # [2, TB]
    w1 = w1_ref[...]                                   # [192, 2]

    # ---- Layer 1: K=2 contraction on the VPU (not the MXU) ----
    # h1[f, b] = w1[f,0]*x[b,0] + w1[f,1]*x[b,1] + b1[f]
    h1 = jnp.tanh(w1[:, 0:1] * xT[0:1, :]
                  + w1[:, 1:2] * xT[1:2, :]
                  + b1_ref[...])                       # [192, TB], f32

    # ---- Layer 2: the only real matmul -> MXU, f32 accumulate ----
    # If w2 arrives as bf16 (opt-in fast path), feed bf16 activations so the
    # MXU runs single-pass; accumulation stays f32 either way.
    h1 = h1.astype(w2_ref.dtype)
    h2 = jnp.dot(w2_ref[...], h1, preferred_element_type=jnp.float32)
    h2 = jnp.tanh(h2 + b2_ref[...])                    # [192, TB], f32

    # ---- Layer 3: N=1 matvec as VPU multiply + sublane reduce (f32) ----
    y = jnp.sum(h2 * w3_ref[...], axis=0, keepdims=True) + b3_ref[...]  # [1, TB]

    o_ref[...] = y.astype(o_ref.dtype)


def _round_up(x, m):
    return ((x + m - 1) // m) * m


def _cdiv(a, b):
    return (a + b - 1) // b


def _select_tiling(B, block_b):
    """Pick (TB, Bp, n_steps): batch tile, padded batch, grid length.

    Policy (perf review):
      * pad batch only to the 128-lane granularity,
      * tiles no larger than block_b (default 4096) to bound VMEM,
      * when there are >= 2 lane-tiles of work, force an even grid of >= 2
        steps so both TensorCores get work on v7x,
      * tiles are equal-sized multiples of 128 covering the work with minimal
        extra padding.
    """
    lane = 128
    B = max(int(B), 1)
    b128 = _round_up(B, lane)
    n_lane_tiles = b128 // lane
    max_tiles_per_step = max(int(block_b) // lane, 1)

    n_steps = _cdiv(n_lane_tiles, max_tiles_per_step)
    if n_lane_tiles >= 2 and n_steps < 2:
        n_steps = 2                      # megacore: keep both TCs busy on v7x
    if n_steps > 1 and n_steps % 2 != 0:
        n_steps += 1                     # prefer an even number of steps

    tiles_per_step = _cdiv(n_lane_tiles, n_steps)
    TB = tiles_per_step * lane
    Bp = TB * n_steps
    return TB, Bp, n_steps


def potential_energy_net_forward(state, params, block_b=4096,
                                 use_bf16_layer2=False):
    """state: [B, 2] float32 -> [B, 1] float32.

    params are in PyTorch layout:
      w1 [192, 2], b1 [192], w2 [192, 192], b2 [192], w3 [1, 192], b3 [1]

    use_bf16_layer2: opt-in bf16 weights/activations for the 192x192 MXU
    matmul (f32 accumulation kept).  Breaks the 1e-5 f32 tolerance.
    """
    w1, b1, w2, b2, w3, b3 = params
    B = state.shape[0]
    H = w1.shape[0]                                   # 192

    TB, Bp, n_steps = _select_tiling(B, block_b)

    # Transposed, padded state: [2, Bp] (features on sublanes, batch on lanes).
    xT = jnp.pad(state.astype(jnp.float32).T, ((0, 0), (0, Bp - B)))

    # Reshape small params to column vectors for the transposed layout.
    b1c = b1.reshape(H, 1)
    b2c = b2.reshape(H, 1)
    w3c = w3.reshape(H, 1)                            # == w3.T
    b3c = b3.reshape(1, 1)

    w2k = w2.astype(jnp.bfloat16) if use_bf16_layer2 else w2

    out = pl.pallas_call(
        _mlp_kernel,
        out_shape=jax.ShapeDtypeStruct((1, Bp), jnp.float32),
        grid_spec=pl.GridSpec(
            grid=(n_steps,),
            in_specs=[
                # state tile: pipelined across the batch grid
                pl.BlockSpec((2, TB), lambda i: (0, i)),
                # weights / biases: constant block index -> DMA'd once,
                # VMEM resident across the whole grid
                pl.BlockSpec((H, 2), lambda i: (0, 0)),
                pl.BlockSpec((H, 1), lambda i: (0, 0)),
                pl.BlockSpec((H, H), lambda i: (0, 0)),
                pl.BlockSpec((H, 1), lambda i: (0, 0)),
                pl.BlockSpec((H, 1), lambda i: (0, 0)),
                pl.BlockSpec((1, 1), lambda i: (0, 0)),
            ],
            out_specs=pl.BlockSpec((1, TB), lambda i: (0, i)),
        ),
        compiler_params=pltpu.CompilerParams(
            # batch axis is fully independent -> shard across TensorCores
            dimension_semantics=(pltpu.PARALLEL,),
            # headroom for TB up to 4096 (v5e default scoped limit is 16 MiB);
            # 32 MiB is <= physical VMEM on every generation incl. v7x.
            vmem_limit_bytes=32 * 1024 * 1024,
        ),
    )(xT, w1, b1c, w2k, b2c, w3c, b3c)

    # [1, Bp] -> [B, 1]
    return out[0, :B].reshape(B, 1)


def init_params(key):
    """Matches the PyTorch module init: weights ~ N(0, 0.1), biases = 0.
    Stored in PyTorch layout ([out, in] weights, [out] biases)."""
    k1, k2, k3 = jax.random.split(key, 3)
    w1 = 0.1 * jax.random.normal(k1, (192, 2), dtype=jnp.float32)
    b1 = jnp.zeros((192,), dtype=jnp.float32)
    w2 = 0.1 * jax.random.normal(k2, (192, 192), dtype=jnp.float32)
    b2 = jnp.zeros((192,), dtype=jnp.float32)
    w3 = 0.1 * jax.random.normal(k3, (1, 192), dtype=jnp.float32)
    b3 = jnp.zeros((1,), dtype=jnp.float32)
    return (w1, b1, w2, b2, w3, b3)


def _reference(state, params):
    w1, b1, w2, b2, w3, b3 = params
    h = jnp.tanh(state @ w1.T + b1)
    h = jnp.tanh(h @ w2.T + b2)
    return h @ w3.T + b3


if __name__ == "__main__":
    key = jax.random.PRNGKey(0)
    pkey, xkey, xkey2 = jax.random.split(key, 3)

    params = init_params(pkey)

    # --- small batch of 2-D states (e.g. (q, p) phase-space points), B=8 ---
    state = jax.random.normal(xkey, (8, 2), dtype=jnp.float32)
    out = jax.block_until_ready(potential_energy_net_forward(state, params))
    ref = _reference(state, params)
    assert out.shape == (8, 1)
    assert jnp.allclose(out, ref, atol=1e-5), "f32 path mismatch vs reference (B=8)"

    # --- awkward batch size: exercises adaptive tiling + multi-step grid ---
    state2 = jax.random.normal(xkey2, (300, 2), dtype=jnp.float32)
    out2 = jax.block_until_ready(potential_energy_net_forward(state2, params))
    ref2 = _reference(state2, params)
    assert out2.shape == (300, 1)
    assert jnp.allclose(out2, ref2, atol=1e-5), "f32 path mismatch vs reference (B=300)"

    # --- opt-in bf16 layer-2 fast path (f32 accumulation, looser tolerance) ---
    out_bf16 = jax.block_until_ready(
        potential_energy_net_forward(state2, params, use_bf16_layer2=True))
    assert out_bf16.shape == (300, 1)
    assert jnp.allclose(out_bf16, ref2, atol=1e-1), "bf16 fast path diverged"

    print("KERNEL_OK")
</pallas_src>

<mosaic_0001>
module attributes {stable_mosaic.version = 11 : i64} {
  func.func @_mlp_kernel(%arg0: i32, %arg1: memref<2x128xf32, #tpu.memory_space<vmem>>, %arg2: memref<192x2xf32, #tpu.memory_space<vmem>>, %arg3: memref<192x1xf32, #tpu.memory_space<vmem>>, %arg4: memref<192x192xf32, #tpu.memory_space<vmem>>, %arg5: memref<192x1xf32, #tpu.memory_space<vmem>>, %arg6: memref<192x1xf32, #tpu.memory_space<vmem>>, %arg7: memref<1x1xf32, #tpu.memory_space<vmem>>, %arg8: memref<1x128xf32, #tpu.memory_space<vmem>>) attributes {dimension_semantics = [#tpu.dimension_semantics<parallel>], iteration_bounds = array<i64: 1>, scalar_prefetch = 0 : i64, scratch_operands = 0 : i64, tpu.core_type = #tpu.core_type<tc>, window_params = [{transform_indices = @transform_0, window_bounds = array<i64: 2, 128>}, {pipeline_mode = #tpu.pipeline_mode<synchronous>, transform_indices = @transform_1, window_bounds = array<i64: 192, 2>}, {pipeline_mode = #tpu.pipeline_mode<synchronous>, transform_indices = @transform_2, window_bounds = array<i64: 192, 1>}, {pipeline_mode = #tpu.pipeline_mode<synchronous>, transform_indices = @transform_3, window_bounds = array<i64: 192, 192>}, {pipeline_mode = #tpu.pipeline_mode<synchronous>, transform_indices = @transform_4, window_bounds = array<i64: 192, 1>}, {pipeline_mode = #tpu.pipeline_mode<synchronous>, transform_indices = @transform_5, window_bounds = array<i64: 192, 1>}, {pipeline_mode = #tpu.pipeline_mode<synchronous>, transform_indices = @transform_6, window_bounds = array<i64: 1, 1>}, {transform_indices = @transform_7, window_bounds = array<i64: 1, 128>}]} {
    %c0 = arith.constant 0 : index
    %c0_0 = arith.constant 0 : index
    %0 = vector.load %arg1[%c0, %c0_0] : memref<2x128xf32, #tpu.memory_space<vmem>>, vector<2x128xf32>
    %c0_1 = arith.constant 0 : index
    %c0_2 = arith.constant 0 : index
    %1 = vector.load %arg2[%c0_1, %c0_2] : memref<192x2xf32, #tpu.memory_space<vmem>>, vector<192x2xf32>
    %2 = vector.extract_strided_slice %1 {offsets = [0, 0], sizes = [192, 1], strides = [1, 1]} : vector<192x2xf32> to vector<192x1xf32>
    %3 = vector.extract_strided_slice %0 {offsets = [0, 0], sizes = [1, 128], strides = [1, 1]} : vector<2x128xf32> to vector<1x128xf32>
    %4 = vector.broadcast %2 : vector<192x1xf32> to vector<192x128xf32>
    %5 = vector.broadcast %3 : vector<1x128xf32> to vector<192x128xf32>
    %6 = arith.mulf %4, %5 : vector<192x128xf32>
    %7 = vector.extract_strided_slice %1 {offsets = [0, 1], sizes = [192, 1], strides = [1, 1]} : vector<192x2xf32> to vector<192x1xf32>
    %8 = vector.extract_strided_slice %0 {offsets = [1, 0], sizes = [1, 128], strides = [1, 1]} : vector<2x128xf32> to vector<1x128xf32>
    %9 = vector.broadcast %7 : vector<192x1xf32> to vector<192x128xf32>
    %10 = vector.broadcast %8 : vector<1x128xf32> to vector<192x128xf32>
    %11 = arith.mulf %9, %10 : vector<192x128xf32>
    %12 = arith.addf %6, %11 : vector<192x128xf32>
    %c0_3 = arith.constant 0 : index
    %c0_4 = arith.constant 0 : index
    %13 = vector.load %arg3[%c0_3, %c0_4] : memref<192x1xf32, #tpu.memory_space<vmem>>, vector<192x1xf32>
    %14 = vector.broadcast %13 : vector<192x1xf32> to vector<192x128xf32>
    %15 = arith.addf %12, %14 : vector<192x128xf32>
    %16 = math.tanh %15 : vector<192x128xf32>
    %c0_5 = arith.constant 0 : index
    %c0_6 = arith.constant 0 : index
    %17 = vector.load %arg4[%c0_5, %c0_6] : memref<192x192xf32, #tpu.memory_space<vmem>>, vector<192x192xf32>
    %cst = arith.constant dense<0.000000e+00> : vector<192x128xf32>
    %18 = tpu.matmul %17, %16, %cst {dimension_numbers = #tpu.dot_dimension_numbers<[1], [0], [0], [1], [0, 0, 1, 1], [], []>} : vector<192x192xf32>, vector<192x128xf32>, vector<192x128xf32> -> vector<192x128xf32>
    %c0_7 = arith.constant 0 : index
    %c0_8 = arith.constant 0 : index
    %19 = vector.load %arg5[%c0_7, %c0_8] : memref<192x1xf32, #tpu.memory_space<vmem>>, vector<192x1xf32>
    %20 = vector.broadcast %19 : vector<192x1xf32> to vector<192x128xf32>
    %21 = arith.addf %18, %20 : vector<192x128xf32>
    %22 = math.tanh %21 : vector<192x128xf32>
    %c0_9 = arith.constant 0 : index
    %c0_10 = arith.constant 0 : index
    %23 = vector.load %arg6[%c0_9, %c0_10] : memref<192x1xf32, #tpu.memory_space<vmem>>, vector<192x1xf32>
    %24 = vector.broadcast %23 : vector<192x1xf32> to vector<192x128xf32>
    %25 = arith.mulf %22, %24 : vector<192x128xf32>
    %cst_11 = arith.constant dense<0.000000e+00> : vector<128xf32>
    %26 = vector.multi_reduction <add>, %25, %cst_11 [0] : vector<192x128xf32> to vector<128xf32>
    %27 = vector.shape_cast %26 : vector<128xf32> to vector<1x128xf32>
    %c0_12 = arith.constant 0 : index
    %c0_13 = arith.constant 0 : index
    %28 = vector.load %arg7[%c0_12, %c0_13] : memref<1x1xf32, #tpu.memory_space<vmem>>, vector<1x1xf32>
    %29 = vector.broadcast %28 : vector<1x1xf32> to vector<1x128xf32>
    %30 = arith.addf %27, %29 : vector<1x128xf32>
    %c0_14 = arith.constant 0 : index
    %c0_15 = arith.constant 0 : index
    %31 = vector.load %arg8[%c0_14, %c0_15] : memref<1x128xf32, #tpu.memory_space<vmem>>, vector<1x128xf32>
    tpu.vector_store %arg8[%c0_14, %c0_15], %30 {strides = array<i32>} : memref<1x128xf32, #tpu.memory_space<vmem>>, vector<1x128xf32>,
    return
  }
  func.func @transform_0(%arg0: i32) -> (i32, i32) {
    %c0_i32 = arith.constant 0 : i32
    %c0_i32_0 = arith.constant 0 : i32
    return %c0_i32, %arg0 : i32, i32
  }
  func.func @transform_1(%arg0: i32) -> (i32, i32) {
    %c0_i32 = arith.constant 0 : i32
    %c0_i32_0 = arith.constant 0 : i32
    %c0_i32_1 = arith.constant 0 : i32
    return %c0_i32, %c0_i32_0 : i32, i32
  }
  func.func @transform_2(%arg0: i32) -> (i32, i32) {
    %c0_i32 = arith.constant 0 : i32
    %c0_i32_0 = arith.constant 0 : i32
    %c0_i32_1 = arith.constant 0 : i32
    return %c0_i32, %c0_i32_0 : i32, i32
  }
  func.func @transform_3(%arg0: i32) -> (i32, i32) {
    %c0_i32 = arith.constant 0 : i32
    %c0_i32_0 = arith.constant 0 : i32
    %c0_i32_1 = arith.constant 0 : i32
    return %c0_i32, %c0_i32_0 : i32, i32
  }
  func.func @transform_4(%arg0: i32) -> (i32, i32) {
    %c0_i32 = arith.constant 0 : i32
    %c0_i32_0 = arith.constant 0 : i32
    %c0_i32_1 = arith.constant 0 : i32
    return %c0_i32, %c0_i32_0 : i32, i32
  }
  func.func @transform_5(%arg0: i32) -> (i32, i32) {
    %c0_i32 = arith.constant 0 : i32
    %c0_i32_0 = arith.constant 0 : i32
    %c0_i32_1 = arith.constant 0 : i32
    return %c0_i32, %c0_i32_0 : i32, i32
  }
  func.func @transform_6(%arg0: i32) -> (i32, i32) {
    %c0_i32 = arith.constant 0 : i32
    %c0_i32_0 = arith.constant 0 : i32
    %c0_i32_1 = arith.constant 0 : i32
    return %c0_i32, %c0_i32_0 : i32, i32
  }
  func.func @transform_7(%arg0: i32) -> (i32, i32) {
    %c0_i32 = arith.constant 0 : i32
    %c0_i32_0 = arith.constant 0 : i32
    return %c0_i32, %arg0 : i32, i32
  }
}

</mosaic_0001>

<bundles_post_ra>
// kernel: tpu_custom_call.1
= control target key start
LH: loop header
LB: loop body
LE: loop exit
PB: predicated region body
PF: predicated region fallthrough
CT: control target
= control target key end

     0   :  { %s2217_s0 = inlined_call_operand.vmem [shape: f32[2,128], index: 0, kind: input, shape index: {}]   ;;  %s2218_s1 = inlined_call_operand.vmem [shape: f32[192,2], index: 1, kind: input, shape index: {}]   ;;  %s2219_s2 = inlined_call_operand.vmem [shape: f32[192,1], index: 2, kind: input, shape index: {}]   ;;  %s2220_s3 = inlined_call_operand.vmem [shape: f32[192,192], index: 3, kind: input, shape index: {}]   ;;  %s2221_s4 = inlined_call_operand.vmem [shape: f32[192,1], index: 4, kind: input, shape index: {}]   ;;  %s2222_s5 = inlined_call_operand.vmem [shape: f32[192,1], index: 5, kind: input, shape index: {}]   ;;  %s2223_s6 = inlined_call_operand.<no memory space> [shape: f32[1,1], index: 6, kind: input, shape index: {}]   ;;  %s2224_s7 = inlined_call_operand.hbm [shape: f32[1,128], index: 7, kind: output, shape index: {}]  }
   0x1   :  { %v12_v0 = vstv %s2223_s6 }
   0x2   :  { %13 = vst [vmem:[#allocation2] sm:$0x1] %v12_v0 }
   0x3   :  { %v34_v1 = vld [vmem:[%s2218_s1 + $0x20] sm:$0xff]  ;;  %v32_v2 = vld [vmem:[%s2218_s1 + $0x10] sm:$0xff]  ;;  %v1406_v4 = vmov 1   ;;  %v1407_v5 = vmov 0  }
   0x4   :  { %v30_v3 = vld [vmem:[%s2218_s1] sm:$0xff]  ;;  %1278 = vset.pattern.permute.xlu0 %v1406_v4  ;;  %1277 = vset.pattern.permute.xlu2 %v1407_v5 }
   0x5   :  { %1276 = vset.pattern.permute.xlu1 %v1407_v5  ;;  %76 = vperm.xlu2 %1277, %v34_v1  }
   0x6   :  { %66 = vperm.xlu1 %1276, %v32_v2   ;;  %200 = vperm.xlu0 %1278, %v30_v3  }
   0x7   :  { %14 = vsyncpa [#allocation4], 0  ;;  %v35_v6 = vld [vmem:[%s2218_s1 + $0x28] sm:$0xff]  ;;  %v33_v7 = vld [vmem:[%s2218_s1 + $0x18] sm:$0xff]  ;;  %vm728_vm0 = vcmask 523264   ;;  %s1216_s21 = sshll.u32 %s2224_s7, 4  ;;  %s1217_s21 = int_to_ptr.hbm [resolvable:$true] %s1216_s21 }
   0x8   :  { %v38_v8 = vld [vmem:[%s2218_s1 + $0x40] sm:$0xff]  ;;  %v37_v9 = vld [vmem:[%s2218_s1 + $0x38] sm:$0xff]  ;;  %v40_v11 = vld [vmem:[%s2218_s1 + $0x50] sm:$0xff] }
   0x9   :  { %v41_v10 = vld [vmem:[%s2218_s1 + $0x58] sm:$0xff]  ;;  %v44_v12 = vld [vmem:[%s2218_s1 + $0x70] sm:$0xff]  ;;  %v43_v13 = vld [vmem:[%s2218_s1 + $0x68] sm:$0xff] }
   0xa   :  { %v47_v14 = vld [vmem:[%s2218_s1 + $0x88] sm:$0xff]  ;;  %v46_v15 = vld [vmem:[%s2218_s1 + $0x80] sm:$0xff]  ;;  %v49_v17 = vld [vmem:[%s2218_s1 + $0x98] sm:$0xff] }
   0xb   :  { %v50_v16 = vld [vmem:[%s2218_s1 + $0xa0] sm:$0xff]  ;;  %v53_v18 = vld [vmem:[%s2218_s1 + $0xb8] sm:$0xff]  ;;  %v52_v19 = vld [vmem:[%s2218_s1 + $0xb0] sm:$0xff] }
   0xc   :  { %v31_v20 = vld [vmem:[%s2218_s1 + $0x8] sm:$0xff]  ;;  %v36_v21 = vld [vmem:[%s2218_s1 + $0x30] sm:$0xff]  ;;  %v42_v24 = vld [vmem:[%s2218_s1 + $0x60] sm:$0xff] }
   0xd   :  { %81 = vperm.xlu2 %1277, %v35_v6   ;;  %v39_v22 = vld [vmem:[%s2218_s1 + $0x48] sm:$0xff]  ;;  %v45_v26 = vld [vmem:[%s2218_s1 + $0x78] sm:$0xff]  ;;  %v48_v28 = vld [vmem:[%s2218_s1 + $0x90] sm:$0xff] }
   0xe   :  { %71 = vperm.xlu1 %1276, %v33_v7   ;;  %220 = vperm.xlu0 %1278, %v35_v6   ;;  %v29_v32 = vld [vmem:[%s2217_s0] sm:$0x3]  ;;  %v51_v33 = vld [vmem:[%s2218_s1 + $0xa8] sm:$0xff]  ;;  %v346_v42 = vld [vmem:[%s2219_s2 + $0x10] sm:$0xff] }
   0xf   :  { %v1536_v34 = vperm.slane %v29_v32, 1  ;;  %v1538_v35 = vperm.slane %v29_v32, 0  ;;  %v345_v43 = vld [vmem:[%s2219_s2 + $0x8] sm:$0xff]  ;;  %v344_v44 = vld [vmem:[%s2219_s2] sm:$0xff]  ;;  %v351_v51 = vld [vmem:[%s2219_s2 + $0x38] sm:$0xff] }
  0x10   :  { %v348_v52 = vld [vmem:[%s2219_s2 + $0x20] sm:$0xff]  ;;  %v347_v53 = vld [vmem:[%s2219_s2 + $0x18] sm:$0xff]  ;;  %v354_v60 = vld [vmem:[%s2219_s2 + $0x50] sm:$0xff] }
  0x11   :  { %v350_v61 = vld [vmem:[%s2219_s2 + $0x30] sm:$0xff]  ;;  %v349_v62 = vld [vmem:[%s2219_s2 + $0x28] sm:$0xff]  ;;  %v359_v32 = vld [vmem:[%s2219_s2 + $0x78] sm:$0xff] }
  0x12   :  { %v353_v6 = vld [vmem:[%s2219_s2 + $0x48] sm:$0xff] }
  0x15   :  { %96 = vperm.xlu2 %1277, %v38_v8  }
  0x16   :  { %91 = vperm.xlu1 %1276, %v37_v9   ;;  %232 = vperm.xlu0 %1278, %v38_v8  }
  0x1d   :  { %111 = vperm.xlu2 %1277, %v41_v10  }
  0x1e   :  { %106 = vperm.xlu1 %1276, %v40_v11   ;;  %244 = vperm.xlu0 %1278, %v41_v10  }
  0x25   :  { %126 = vperm.xlu2 %1277, %v44_v12  }
  0x26   :  { %121 = vperm.xlu1 %1276, %v43_v13   ;;  %256 = vperm.xlu0 %1278, %v44_v12  }
  0x2d   :  { %141 = vperm.xlu2 %1277, %v47_v14  }
  0x2e   :  { %136 = vperm.xlu1 %1276, %v46_v15   ;;  %268 = vperm.xlu0 %1278, %v47_v14  }
  0x35   :  { %156 = vperm.xlu2 %1277, %v50_v16  }
  0x36   :  { %151 = vperm.xlu1 %1276, %v49_v17   ;;  %280 = vperm.xlu0 %1278, %v50_v16  }
  0x3d   :  { %171 = vperm.xlu2 %1277, %v53_v18  }
  0x3e   :  { %166 = vperm.xlu1 %1276, %v52_v19   ;;  %292 = vperm.xlu0 %1278, %v53_v18   ;;  %v356_v18 = vld [vmem:[%s2219_s2 + $0x60] sm:$0xff] }
  0x45   :  { %1280 = vset.pattern.permute.xlu2 %v1406_v4 }
  0x46   :  { %1279 = vset.pattern.permute.xlu1 %v1406_v4  ;;  %1281 = vset.pattern.permute.xlu0 %v1407_v5 }
  0x47   :  { %208 = vperm.xlu2 %1280, %v32_v2   ;;  %204 = vperm.xlu1 %1279, %v31_v20  }
  0x48   :  { %56 = vperm.xlu0 %1281, %v30_v3  }
  0x4f   :  { %216 = vperm.xlu2 %1280, %v34_v1   ;;  %212 = vperm.xlu1 %1279, %v33_v7   ;;  %v352_v7 = vld [vmem:[%s2219_s2 + $0x40] sm:$0xff] }
  0x50   :  { %61 = vperm.xlu0 %1281, %v31_v20  }
  0x57   :  { %228 = vperm.xlu2 %1280, %v37_v9   ;;  %224 = vperm.xlu1 %1279, %v36_v21  }
  0x58   :  { %86 = vperm.xlu0 %1281, %v36_v21  }
  0x5f   :  { %240 = vperm.xlu2 %1280, %v40_v11   ;;  %236 = vperm.xlu1 %1279, %v39_v22   ;;  %v1515_v23 = vpop.permute.xlu2 %76 }
  0x60   :  { %101 = vperm.xlu0 %1281, %v39_v22  }
  0x67   :  { %252 = vperm.xlu2 %1280, %v43_v13   ;;  %248 = vperm.xlu1 %1279, %v42_v24   ;;  %v82_v25 = vpop.permute.xlu2 %81 }
  0x68   :  { %116 = vperm.xlu0 %1281, %v42_v24   ;;  %v180_v39 = vmul.f32 %v1538_v35, %v82_v25 }
  0x6f   :  { %264 = vperm.xlu2 %1280, %v46_v15   ;;  %260 = vperm.xlu1 %1279, %v45_v26   ;;  %v97_v27 = vpop.permute.xlu2 %96 }
  0x70   :  { %131 = vperm.xlu0 %1281, %v45_v26   ;;  %v183_v48 = vmul.f32 %v1538_v35, %v97_v27  ;;  %v179_v26 = vmul.f32 %v1538_v35, %v1515_v23 }
  0x77   :  { %276 = vperm.xlu2 %1280, %v49_v17   ;;  %272 = vperm.xlu1 %1279, %v48_v28   ;;  %v112_v29 = vpop.permute.xlu2 %111  ;;  %v360_v17 = vld [vmem:[%s2219_s2 + $0x80] sm:$0xff] }
  0x78   :  { %146 = vperm.xlu0 %1281, %v48_v28   ;;  %v1526_v30 = vpop.permute.xlu1 %66  ;;  %v1528_v31 = vpop.permute.xlu0 %200  ;;  %v186_v57 = vmul.f32 %v1538_v35, %v112_v29 }
  0x79   :  { %v177_v13 = vmul.f32 %v1538_v35, %v1526_v30  ;;  %v366_v30 = vld [vmem:[%s2219_s2 + $0xb0] sm:$0xff] }
  0x7f   :  { %288 = vperm.xlu2 %1280, %v52_v19   ;;  %284 = vperm.xlu1 %1279, %v51_v33   ;;  %v127_v36 = vpop.permute.xlu2 %126  ;;  %v355_v19 = vld [vmem:[%s2219_s2 + $0x58] sm:$0xff] }
  0x80   :  { %161 = vperm.xlu0 %1281, %v51_v33   ;;  %v1540_v37 = vpop.permute.xlu1 %71  ;;  %v221_v38 = vpop.permute.xlu0 %220  ;;  %v189_v2 = vmul.f32 %v1538_v35, %v127_v36  ;;  %v358_v33 = vld [vmem:[%s2219_s2 + $0x70] sm:$0xff] }
  0x81   :  { %v301_v40 = vmul.f32 %v1536_v34, %v221_v38 }
  0x83   :  { %v1544_v41 = vadd.f32 %v301_v40, %v180_v39 }
  0x87   :  { %1283 = vset.pattern.permute.xlu2 %v1407_v5  ;;  %1282 = vset.pattern.permute.xlu1 %v1407_v5  ;;  %v142_v45 = vpop.permute.xlu2 %141  ;;  %v357_v5 = vld [vmem:[%s2219_s2 + $0x68] sm:$0xff] }
  0x88   :  { %380 = vperm.xlu0 %1281, %v346_v42   ;;  %375 = vperm.xlu2 %1283, %v345_v43   ;;  %v1557_v46 = vpop.permute.xlu1 %91  ;;  %v233_v47 = vpop.permute.xlu0 %232  ;;  %v192_v10 = vmul.f32 %v1538_v35, %v142_v45 }
  0x89   :  { %370 = vperm.xlu1 %1282, %v344_v44   ;;  %v304_v49 = vmul.f32 %v1536_v34, %v233_v47  ;;  %v182_v42 = vmul.f32 %v1538_v35, %v1557_v46  ;;  %v363_v47 = vld [vmem:[%s2219_s2 + $0x98] sm:$0xff] }
  0x8b   :  { %v1561_v50 = vadd.f32 %v304_v49, %v183_v48  ;;  %v367_v48 = vld [vmem:[%s2219_s2 + $0xb8] sm:$0xff]  ;;  %v361_v49 = vld [vmem:[%s2219_s2 + $0x88] sm:$0xff] }
  0x8f   :  { %v157_v54 = vpop.permute.xlu2 %156 }
  0x90   :  { %405 = vperm.xlu0 %1281, %v351_v51   ;;  %390 = vperm.xlu2 %1283, %v348_v52   ;;  %v1572_v55 = vpop.permute.xlu1 %106  ;;  %v245_v56 = vpop.permute.xlu0 %244  ;;  %v195_v22 = vmul.f32 %v1538_v35, %v157_v54 }
  0x91   :  { %385 = vperm.xlu1 %1282, %v347_v53   ;;  %v307_v58 = vmul.f32 %v1536_v34, %v245_v56  ;;  %v185_v52 = vmul.f32 %v1538_v35, %v1572_v55  ;;  %v296_v56 = vmul.f32 %v1536_v34, %v1528_v31  ;;  %v365_v55 = vld [vmem:[%s2219_s2 + $0xa8] sm:$0xff] }
  0x93   :  { %v1576_v59 = vadd.f32 %v307_v58, %v186_v57 }
  0x97   :  { %v172_v63 = vpop.permute.xlu2 %171 }
  0x98   :  { %420 = vperm.xlu0 %1281, %v354_v60   ;;  %400 = vperm.xlu2 %1283, %v350_v61   ;;  %v1587_v0 = vpop.permute.xlu1 %121  ;;  %v257_v1 = vpop.permute.xlu0 %256  ;;  %v198_v38 = vmul.f32 %v1538_v35, %v172_v63  ;;  %v585_v60 = vld [vmem:[%s2221_s4 + $0x8] sm:$0xff]  ;;  %v364_v61 = vld [vmem:[%s2219_s2 + $0xa0] sm:$0xff] }
  0x99   :  { %395 = vperm.xlu1 %1282, %v349_v62   ;;  %v310_v3 = vmul.f32 %v1536_v34, %v257_v1  ;;  %v178_v1 = vmul.f32 %v1538_v35, %v1540_v37  ;;  %v588_v37 = vld [vmem:[%s2221_s4 + $0x20] sm:$0xff] }
  0x9b   :  { %v1591_v4 = vadd.f32 %v310_v3, %v189_v2  ;;  %v188_v2 = vmul.f32 %v1538_v35, %v1587_v0  ;;  %v584_v0 = vld [vmem:[%s2221_s4] sm:$0xff] }
  0xa0   :  { %435 = vperm.xlu0 %1281, %v357_v5   ;;  %415 = vperm.xlu2 %1283, %v353_v6   ;;  %v1602_v8 = vpop.permute.xlu1 %136  ;;  %v269_v9 = vpop.permute.xlu0 %268 }
  0xa1   :  { %410 = vperm.xlu1 %1282, %v352_v7   ;;  %v313_v11 = vmul.f32 %v1536_v34, %v269_v9  ;;  %v209_v12 = vpop.permute.xlu2 %208 }
  0xa2   :  { %v298_v14 = vmul.f32 %v1536_v34, %v209_v12 }
  0xa3   :  { %v1609_v15 = vadd.f32 %v313_v11, %v192_v10 }
  0xa4   :  { %v1611_v16 = vadd.f32 %v298_v14, %v177_v13  ;;  %v362_v13 = vld [vmem:[%s2219_s2 + $0x90] sm:$0xff] }
  0xa8   :  { %450 = vperm.xlu0 %1281, %v360_v17   ;;  %430 = vperm.xlu2 %1283, %v356_v18   ;;  %v1622_v20 = vpop.permute.xlu1 %151  ;;  %v281_v21 = vpop.permute.xlu0 %280  ;;  %v191_v18 = vmul.f32 %v1538_v35, %v1602_v8  ;;  %v586_v8 = vld [vmem:[%s2221_s4 + $0x10] sm:$0xff] }
  0xa9   :  { %425 = vperm.xlu1 %1282, %v355_v19   ;;  %v316_v24 = vmul.f32 %v1536_v34, %v281_v21  ;;  %v217_v25 = vpop.permute.xlu2 %216 }
  0xaa   :  { %v300_v27 = vmul.f32 %v1536_v34, %v217_v25 }
  0xab   :  { %v1629_v28 = vadd.f32 %v316_v24, %v195_v22 }
  0xac   :  { %v1631_v29 = vadd.f32 %v300_v27, %v179_v26  ;;  %v591_v26 = vld [vmem:[%s2221_s4 + $0x38] sm:$0xff] }
  0xad   :  { %v587_v27 = vld [vmem:[%s2221_s4 + $0x18] sm:$0xff] }
  0xb0   :  { %480 = vperm.xlu0 %1281, %v366_v30   ;;  %445 = vperm.xlu2 %1283, %v359_v32   ;;  %v1642_v23 = vpop.permute.xlu1 %166  ;;  %v293_v36 = vpop.permute.xlu0 %292 }
  0xb1   :  { %440 = vperm.xlu1 %1282, %v358_v33   ;;  %v319_v39 = vmul.f32 %v1536_v34, %v293_v36  ;;  %v229_v40 = vpop.permute.xlu2 %228  ;;  %v194_v36 = vmul.f32 %v1538_v35, %v1622_v20  ;;  %v589_v20 = vld [vmem:[%s2221_s4 + $0x28] sm:$0xff] }
  0xb2   :  { %v303_v43 = vmul.f32 %v1536_v34, %v229_v40 }
  0xb3   :  { %v1649_v44 = vadd.f32 %v319_v39, %v198_v38 }
  0xb4   :  { %v1651_v45 = vadd.f32 %v303_v43, %v182_v42 }
  0xb8   :  { %465 = vperm.xlu0 %1281, %v363_v47   ;;  %485 = vperm.xlu2 %1283, %v367_v48   ;;  %v594_v47 = vld [vmem:[%s2221_s4 + $0x50] sm:$0xff] }
  0xb9   :  { %455 = vperm.xlu1 %1282, %v361_v49   ;;  %v241_v46 = vpop.permute.xlu2 %240  ;;  %v205_v51 = vpop.permute.xlu1 %204  ;;  %v590_v48 = vld [vmem:[%s2221_s4 + $0x30] sm:$0xff] }
  0xba   :  { %v306_v53 = vmul.f32 %v1536_v34, %v241_v46  ;;  %v57_v54 = vpop.permute.xlu0 %56  ;;  %v297_v7 = vmul.f32 %v1536_v34, %v205_v51 }
  0xbb   :  { %v175_v57 = vmul.f32 %v1538_v35, %v57_v54 }
  0xbc   :  { %v1668_v58 = vadd.f32 %v306_v53, %v185_v52  ;;  %v197_v52 = vmul.f32 %v1538_v35, %v1642_v23  ;;  %v592_v23 = vld [vmem:[%s2221_s4 + $0x40] sm:$0xff] }
  0xbd   :  { %v1676_v62 = vadd.f32 %v296_v56, %v175_v57 }
  0xc0   :  { %615 = vperm.xlu0 %1281, %v585_v60   ;;  %470 = vperm.xlu2 %1283, %v364_v61   ;;  %v597_v61 = vld [vmem:[%s2221_s4 + $0x68] sm:$0xff] }
  0xc1   :  { %475 = vperm.xlu1 %1282, %v365_v55   ;;  %v253_v31 = vpop.permute.xlu2 %252  ;;  %v213_v63 = vpop.permute.xlu1 %212  ;;  %v593_v55 = vld [vmem:[%s2221_s4 + $0x48] sm:$0xff] }
  0xc2   :  { %v309_v3 = vmul.f32 %v1536_v34, %v253_v31  ;;  %v299_v5 = vmul.f32 %v1536_v34, %v213_v63  ;;  %v62_v6 = vpop.permute.xlu0 %61 }
  0xc3   :  { %v176_v9 = vmul.f32 %v1538_v35, %v62_v6  ;;  %v596_v6 = vld [vmem:[%s2221_s4 + $0x60] sm:$0xff] }
  0xc4   :  { %v1689_v10 = vadd.f32 %v299_v5, %v178_v1  ;;  %v1691_v11 = vadd.f32 %v309_v3, %v188_v2  ;;  %v600_v5 = vld [vmem:[%s2221_s4 + $0x80] sm:$0xff] }
  0xc5   :  { %v321_v12 = vadd.f32 %v297_v7, %v176_v9  ;;  %v595_v7 = vld [vmem:[%s2221_s4 + $0x58] sm:$0xff] }
  0xc8   :  { %630 = vperm.xlu0 %1281, %v588_v37   ;;  %610 = vperm.xlu2 %1283, %v584_v0  }
  0xc9   :  { %460 = vperm.xlu1 %1282, %v362_v13   ;;  %v265_v14 = vpop.permute.xlu2 %264  ;;  %v225_v17 = vpop.permute.xlu1 %224 }
  0xca   :  { %v312_v19 = vmul.f32 %v1536_v34, %v265_v14  ;;  %v302_v21 = vmul.f32 %v1536_v34, %v225_v17  ;;  %v87_v22 = vpop.permute.xlu0 %86  ;;  %v603_v17 = vld [vmem:[%s2221_s4 + $0x98] sm:$0xff] }
  0xcb   :  { %v181_v24 = vmul.f32 %v1538_v35, %v87_v22 }
  0xcc   :  { %v1707_v25 = vadd.f32 %v312_v19, %v191_v18  ;;  %v599_v18 = vld [vmem:[%s2221_s4 + $0x78] sm:$0xff] }
  0xcd   :  { %v326_v30 = vadd.f32 %v302_v21, %v181_v24  ;;  %v598_v21 = vld [vmem:[%s2221_s4 + $0x70] sm:$0xff] }
  0xd0   :  { %645 = vperm.xlu0 %1281, %v591_v26   ;;  %625 = vperm.xlu2 %1283, %v587_v27   ;;  %v606_v27 = vld [vmem:[%s2221_s4 + $0xb0] sm:$0xff] }
  0xd1   :  { %620 = vperm.xlu1 %1282, %v586_v8   ;;  %v277_v32 = vpop.permute.xlu2 %276  ;;  %v237_v33 = vpop.permute.xlu1 %236  ;;  %v602_v8 = vld [vmem:[%s2221_s4 + $0x90] sm:$0xff] }
  0xd2   :  { %v315_v38 = vmul.f32 %v1536_v34, %v277_v32  ;;  %v305_v39 = vmul.f32 %v1536_v34, %v237_v33  ;;  %v102_v40 = vpop.permute.xlu0 %101  ;;  %v601_v32 = vld [vmem:[%s2221_s4 + $0x88] sm:$0xff] }
  0xd3   :  { %v184_v42 = vmul.f32 %v1538_v35, %v102_v40  ;;  %v1004_v40 = vld [vmem:[%s2222_s5 + $0x8] sm:$0xff] }
  0xd4   :  { %v1723_v43 = vadd.f32 %v315_v38, %v194_v36 }
  0xd5   :  { %v1731_v49 = vadd.f32 %v305_v39, %v184_v42  ;;  %v605_v42 = vld [vmem:[%s2221_s4 + $0xa8] sm:$0xff] }
  0xd8   :  { %660 = vperm.xlu0 %1281, %v594_v47   ;;  %640 = vperm.xlu2 %1283, %v590_v48   ;;  %v604_v47 = vld [vmem:[%s2221_s4 + $0xa0] sm:$0xff] }
  0xd9   :  { %635 = vperm.xlu1 %1282, %v589_v20   ;;  %v289_v46 = vpop.permute.xlu2 %288  ;;  %v249_v51 = vpop.permute.xlu1 %248 }
  0xda   :  { %v318_v53 = vmul.f32 %v1536_v34, %v289_v46  ;;  %v308_v54 = vmul.f32 %v1536_v34, %v249_v51  ;;  %v117_v56 = vpop.permute.xlu0 %116  ;;  %v1007_v51 = vld [vmem:[%s2222_s5 + $0x20] sm:$0xff] }
  0xdb   :  { %v187_v57 = vmul.f32 %v1538_v35, %v117_v56 }
  0xdc   :  { %v1741_v60 = vadd.f32 %v318_v53, %v197_v52  ;;  %v1003_v52 = vld [vmem:[%s2222_s5] sm:$0xff]  ;;  %v607_v53 = vld [vmem:[%s2221_s4 + $0xb8] sm:$0xff] }
  0xdd   :  { %v1749_v31 = vadd.f32 %v308_v54, %v187_v57 }
  0xe0   :  { %675 = vperm.xlu0 %1281, %v597_v61   ;;  %655 = vperm.xlu2 %1283, %v593_v55  }
  0xe1   :  { %650 = vperm.xlu1 %1282, %v592_v23   ;;  %v261_v63 = vpop.permute.xlu1 %260  ;;  %v1010_v23 = vld [vmem:[%s2222_s5 + $0x38] sm:$0xff] }
  0xe2   :  { %v132_v1 = vpop.permute.xlu0 %131  ;;  %v376_v2 = vpop.permute.xlu2 %375  ;;  %v311_v20 = vmul.f32 %v1536_v34, %v261_v63  ;;  %v1006_v63 = vld [vmem:[%s2222_s5 + $0x18] sm:$0xff] }
  0xe3   :  { %v1754_v3 = vadd.f32 %v376_v2, %v321_v12  ;;  %v190_v46 = vmul.f32 %v1538_v35, %v132_v1  ;;  %v1005_v1 = vld [vmem:[%s2222_s5 + $0x10] sm:$0xff] }
  0xe5   :  { %v335_v54 = vadd.f32 %v311_v20, %v190_v46 }
  0xe8   :  { %690 = vperm.xlu0 %1281, %v600_v5   ;;  %670 = vperm.xlu2 %1283, %v596_v6  }
  0xe9   :  { %665 = vperm.xlu1 %1282, %v595_v7   ;;  %v273_v9 = vpop.permute.xlu1 %272 }
  0xea   :  { %v314_v37 = vmul.f32 %v1536_v34, %v273_v9  ;;  %v147_v0 = vpop.permute.xlu0 %146  ;;  %v391_v12 = vpop.permute.xlu2 %390 }
  0xeb   :  { %v193_v13 = vmul.f32 %v1538_v35, %v147_v0  ;;  %v1768_v14 = vadd.f32 %v391_v12, %v1631_v29  ;;  %v1009_v0 = vld [vmem:[%s2222_s5 + $0x30] sm:$0xff]  ;;  %v1008_v12 = vld [vmem:[%s2222_s5 + $0x28] sm:$0xff] }
  0xed   :  { %v1776_v19 = vadd.f32 %v314_v37, %v193_v13  ;;  %v1013_v37 = vld [vmem:[%s2222_s5 + $0x50] sm:$0xff] }
  0xf0   :  { %705 = vperm.xlu0 %1281, %v603_v17   ;;  %685 = vperm.xlu2 %1283, %v599_v18   ;;  %v1016_v18 = vld [vmem:[%s2222_s5 + $0x68] sm:$0xff] }
  0xf1   :  { %680 = vperm.xlu1 %1282, %v598_v21   ;;  %v1781_v22 = vpop.permute.xlu1 %284  ;;  %v1012_v21 = vld [vmem:[%s2222_s5 + $0x48] sm:$0xff] }
  0xf2   :  { %v1783_v29 = vpop.permute.xlu0 %161  ;;  %v401_v24 = vpop.permute.xlu2 %400 }
  0xf3   :  { %v1785_v26 = vadd.f32 %v401_v24, %v326_v30  ;;  %v1011_v24 = vld [vmem:[%s2222_s5 + $0x40] sm:$0xff] }
  0xf8   :  { %720 = vperm.xlu0 %1281, %v606_v27   ;;  %700 = vperm.xlu2 %1283, %v602_v8  }
  0xf9   :  { %695 = vperm.xlu1 %1282, %v601_v32  }
  0xfa   :  { %v381_v33 = vpop.permute.xlu0 %380  ;;  %v1796_v36 = vpop.permute.xlu2 %415 }
  0xfb   :  { %v1799_v30 = vadd.f32 %v381_v33, %v1611_v16  ;;  %v371_v38 = vpop.permute.xlu1 %370 }
  0xfc   :  { %v1802_v39 = vadd.f32 %v371_v38, %v1676_v62 }
 0x100   :  { %1034 = vperm.xlu0 %1281, %v1004_v40   ;;  %715 = vperm.xlu2 %1283, %v605_v42   ;;  %v1019_v40 = vld [vmem:[%s2222_s5 + $0x80] sm:$0xff] }
 0x101   :  { %710 = vperm.xlu1 %1282, %v604_v47   ;;  %v1015_v42 = vld [vmem:[%s2222_s5 + $0x60] sm:$0xff] }
 0x102   :  { %v1813_v16 = vpop.permute.xlu0 %405  ;;  %v431_v48 = vpop.permute.xlu2 %430 }
 0x103   :  { %v1815_v62 = vpop.permute.xlu1 %385  ;;  %v500_v47 = vadd.f32 %v431_v48, %v1749_v31  ;;  %v497_v31 = vadd.f32 %v1796_v36, %v1731_v49  ;;  %v196_v49 = vmul.f32 %v1538_v35, %v1783_v29  ;;  %v1017_v36 = vld [vmem:[%s2222_s5 + $0x70] sm:$0xff] }
 0x108   :  { %1049 = vperm.xlu0 %1281, %v1007_v51   ;;  %1029 = vperm.xlu2 %1283, %v1003_v52   ;;  %v317_v52 = vmul.f32 %v1536_v34, %v1781_v22 }
 0x109   :  { %725 = vperm.xlu1 %1282, %v607_v53  }
 0x10a   :  { %v421_v56 = vpop.permute.xlu0 %420  ;;  %v446_v57 = vpop.permute.xlu2 %445  ;;  %v341_v22 = vadd.f32 %v317_v52, %v196_v49  ;;  %v546_v52 = vld [vmem:[%s2220_s3 + $0x50] sm:$0xff]  ;;  %v568_v49 = vld [vmem:[%s2220_s3 + $0x100] sm:$0xff] }
 0x10b   :  { %v503_v61 = vadd.f32 %v446_v57, %v335_v54  ;;  %v1828_v55 = vpop.permute.xlu1 %395 }
 0x10d   :  { %1284 = vtanh.f32 %v503_v61 }
 0x110   :  { %1064 = vperm.xlu0 %1281, %v1010_v23   ;;  %1044 = vperm.xlu2 %1283, %v1006_v63   ;;  %v493_v23 = vadd.f32 %v1828_v55, %v1544_v41 }
 0x111   :  { %1039 = vperm.xlu1 %1282, %v1005_v1   ;;  %v1021_v1 = vld [vmem:[%s2222_s5 + $0x90] sm:$0xff] }
 0x112   :  { %v436_v2 = vpop.permute.xlu0 %435  ;;  %v486_v5 = vpop.permute.xlu2 %485 }
 0x113   :  { %v511_v6 = vadd.f32 %v486_v5, %v1649_v44  ;;  %v411_v7 = vpop.permute.xlu1 %410  ;;  %v1285_v9 = vpop.eup %1284  ;;  %v501_v33 = vadd.f32 %v436_v2, %v1691_v11  ;;  %v491_v2 = vadd.f32 %v1815_v62, %v1689_v10 }
 0x114   :  { %801 = vmatpush.msra.mxu0 %v1285_v9  ;;  %1249 = vmatpush.msra.mxu2 %v1285_v9  ;;  %v496_v53 = vadd.f32 %v411_v7, %v1561_v50 }
 0x115   :  { %1286 = vtanh.f32 %v511_v6 }
 0x118   :  { %1079 = vperm.xlu0 %1281, %v1013_v37   ;;  %1059 = vperm.xlu2 %1283, %v1009_v0  }
 0x119   :  { %1054 = vperm.xlu1 %1282, %v1008_v12  }
 0x11a   :  { %v1849_v44 = vpop.permute.xlu0 %450  ;;  %v471_v34 = vpop.permute.xlu2 %470 }
 0x11b   :  { %v426_v13 = vpop.permute.xlu1 %425  ;;  %v1287_v17 = vpop.eup %1286  ;;  %v508_v50 = vadd.f32 %v471_v34, %v1629_v28  ;;  %v1020_v28 = vld [vmem:[%s2222_s5 + $0x88] sm:$0xff] }
 0x11c   :  { %898 = vmatpush.msra.mxu1 %v1287_v17  ;;  %1265 = vmatpush.msra.mxu3 %v1287_v17  ;;  %v499_v11 = vadd.f32 %v426_v13, %v1576_v59  ;;  %v1022_v59 = vld [vmem:[%s2222_s5 + $0x98] sm:$0xff]  ;;  %v549_v34 = vld [vmem:[%s2220_s3 + $0x68] sm:$0xff] }
 0x11d   :  { %v1026_v13 = vld [vmem:[%s2222_s5 + $0xb8] sm:$0xff] }
 0x120   :  { %1094 = vperm.xlu0 %1281, %v1016_v18   ;;  %1074 = vperm.xlu2 %1283, %v1012_v21   ;;  %v536_v18 = vld [vmem:[%s2220_s3] sm:$0xff]  ;;  %v558_v21 = vld [vmem:[%s2220_s3 + $0xb0] sm:$0xff] }
 0x121   :  { %1069 = vperm.xlu1 %1282, %v1011_v24  }
 0x122   :  { %v481_v27 = vpop.permute.xlu0 %480 }
 0x123   :  { %v510_v8 = vadd.f32 %v481_v27, %v1741_v60  ;;  %v441_v32 = vpop.permute.xlu1 %440  ;;  %v1014_v60 = vld [vmem:[%s2222_s5 + $0x58] sm:$0xff]  ;;  %v537_v27 = vld [vmem:[%s2220_s3 + $0x8] sm:$0xff] }
 0x124   :  { %v502_v38 = vadd.f32 %v441_v32, %v1591_v4  ;;  %v498_v4 = vadd.f32 %v421_v56, %v1668_v58  ;;  %v1018_v58 = vld [vmem:[%s2222_s5 + $0x78] sm:$0xff]  ;;  %v495_v56 = vadd.f32 %v1813_v16, %v1651_v45  ;;  %v1025_v45 = vld [vmem:[%s2222_s5 + $0xb0] sm:$0xff] }
 0x125   :  { %1288 = vtanh.f32 %v510_v8  ;;  %v563_v8 = vld [vmem:[%s2220_s3 + $0xd8] sm:$0xff]  ;;  %v538_v32 = vld [vmem:[%s2220_s3 + $0x10] sm:$0xff] }
 0x126   :  { %1290 = vtanh.f32 %v502_v38  ;;  %v539_v38 = vld [vmem:[%s2220_s3 + $0x18] sm:$0xff] }
 0x127   :  { %1292 = vtanh.f32 %v501_v33  ;;  %v560_v33 = vld [vmem:[%s2220_s3 + $0xc0] sm:$0xff] }
 0x128   :  { %1109 = vperm.xlu0 %1281, %v1019_v40   ;;  %1089 = vperm.xlu2 %1283, %v1015_v42   ;;  %1294 = vtanh.f32 %v500_v47  ;;  %v565_v40 = vld [vmem:[%s2220_s3 + $0xe8] sm:$0xff]  ;;  %v540_v42 = vld [vmem:[%s2220_s3 + $0x20] sm:$0xff]  ;;  %v562_v47 = vld [vmem:[%s2220_s3 + $0xd0] sm:$0xff] }
 0x129   :  { %1084 = vperm.xlu1 %1282, %v1014_v60   ;;  %1296 = vtanh.f32 %v499_v11  ;;  %v541_v60 = vld [vmem:[%s2220_s3 + $0x28] sm:$0xff]  ;;  %v567_v11 = vld [vmem:[%s2220_s3 + $0xf8] sm:$0xff] }
 0x12a   :  { %1298 = vtanh.f32 %v498_v4  ;;  %v466_v63 = vpop.permute.xlu0 %465  ;;  %v542_v4 = vld [vmem:[%s2220_s3 + $0x30] sm:$0xff] }
 0x12b   :  { %v1289_v20 = vpop.eup %1288  ;;  %v1875_v46 = vpop.permute.xlu1 %455  ;;  %1300 = vtanh.f32 %v497_v31  ;;  %v507_v41 = vadd.f32 %v466_v63, %v1723_v43  ;;  %v544_v31 = vld [vmem:[%s2220_s3 + $0x40] sm:$0xff]  ;;  %v553_v63 = vld [vmem:[%s2220_s3 + $0x88] sm:$0xff] }
 0x12c   :  { %v1291_v51 = vpop.eup %1290  ;;  %899 = vmatpush.msra.mxu1 %v1289_v20  ;;  %1266 = vmatpush.msra.mxu3 %v1289_v20  ;;  %1302 = vtanh.f32 %v496_v53  ;;  %v505_v43 = vadd.f32 %v1875_v46, %v1609_v15  ;;  %v1023_v15 = vld [vmem:[%s2222_s5 + $0xa0] sm:$0xff]  ;;  %v543_v46 = vld [vmem:[%s2220_s3 + $0x38] sm:$0xff]  ;;  %v573_v53 = vld [vmem:[%s2220_s3 + $0x128] sm:$0xff] }
 0x12d   :  { %802 = vmatpush.msra.mxu0 %v1291_v51  ;;  %1250 = vmatpush.msra.mxu2 %v1291_v51  ;;  %v1293_v48 = vpop.eup %1292  ;;  %1304 = vtanh.f32 %v495_v56  ;;  %v564_v20 = vld [vmem:[%s2220_s3 + $0xe0] sm:$0xff]  ;;  %v569_v51 = vld [vmem:[%s2220_s3 + $0x108] sm:$0xff]  ;;  %v570_v56 = vld [vmem:[%s2220_s3 + $0x110] sm:$0xff] }
 0x12e   :  { %v1295_v54 = vpop.eup %1294 }
 0x12f   :  { %803 = vmatpush.msra.mxu0 %v1293_v48  ;;  %1251 = vmatpush.msra.mxu2 %v1293_v48  ;;  %v1297_v35 = vpop.eup %1296  ;;  %v571_v48 = vld [vmem:[%s2220_s3 + $0x118] sm:$0xff] }
 0x130   :  { %1124 = vperm.xlu0 %1281, %v1022_v59   ;;  %1104 = vperm.xlu2 %1283, %v1018_v58   ;;  %v1299_v57 = vpop.eup %1298  ;;  %v566_v59 = vld [vmem:[%s2220_s3 + $0xf0] sm:$0xff]  ;;  %v545_v58 = vld [vmem:[%s2220_s3 + $0x48] sm:$0xff] }
 0x131   :  { %1099 = vperm.xlu1 %1282, %v1017_v36   ;;  %804 = vmatpush.msra.mxu0 %v1295_v54  ;;  %v1301_v16 = vpop.eup %1300  ;;  %v547_v36 = vld [vmem:[%s2220_s3 + $0x58] sm:$0xff] }
 0x132   :  { %1252 = vmatpush.msra.mxu2 %v1295_v54  ;;  %v1303_v55 = vpop.eup %1302  ;;  %v548_v54 = vld [vmem:[%s2220_s3 + $0x60] sm:$0xff] }
 0x133   :  { %v476_v29 = vpop.permute.xlu1 %475  ;;  %805 = vmatpush.msra.mxu0 %v1297_v35  ;;  %v1305_v5 = vpop.eup %1304 }
 0x134   :  { %v509_v61 = vadd.f32 %v476_v29, %v341_v22  ;;  %1253 = vmatpush.msra.mxu2 %v1297_v35  ;;  %v575_v35 = vld [vmem:[%s2220_s3 + $0x138] sm:$0xff]  ;;  %v550_v22 = vld [vmem:[%s2220_s3 + $0x70] sm:$0xff]  ;;  %v572_v29 = vld [vmem:[%s2220_s3 + $0x120] sm:$0xff] }
 0x135   :  { %806 = vmatpush.msra.mxu0 %v1299_v57 }
 0x136   :  { %1306 = vtanh.f32 %v509_v61  ;;  %1254 = vmatpush.msra.mxu2 %v1299_v57  ;;  %v551_v57 = vld [vmem:[%s2220_s3 + $0x78] sm:$0xff]  ;;  %v552_v61 = vld [vmem:[%s2220_s3 + $0x80] sm:$0xff] }
 0x137   :  { %1308 = vtanh.f32 %v1785_v26  ;;  %807 = vmatpush.msra.mxu0 %v1301_v16 }
 0x138   :  { %1310 = vtanh.f32 %v508_v50  ;;  %1255 = vmatpush.msra.mxu2 %v1301_v16  ;;  %1139 = vperm.xlu0 %1281, %v1025_v45   ;;  %v577_v50 = vld [vmem:[%s2220_s3 + $0x148] sm:$0xff]  ;;  %v579_v45 = vld [vmem:[%s2220_s3 + $0x158] sm:$0xff]  ;;  %v611_v16 = vpop.permute.xlu2 %610 }
 0x139   :  { %1312 = vtanh.f32 %v493_v23  ;;  %1119 = vperm.xlu2 %1283, %v1021_v1   ;;  %1114 = vperm.xlu1 %1282, %v1020_v28   ;;  %v574_v23 = vld [vmem:[%s2220_s3 + $0x130] sm:$0xff]  ;;  %v616_v1 = vpop.permute.xlu0 %615 }
 0x13a   :  { %808 = vmatpush.msra.mxu0 %v1303_v55  ;;  %1256 = vmatpush.msra.mxu2 %v1303_v55  ;;  %1314 = vtanh.f32 %v1768_v14  ;;  %v1024_v14 = vld [vmem:[%s2222_s5 + $0xa8] sm:$0xff]  ;;  %v554_v28 = vld [vmem:[%s2220_s3 + $0x90] sm:$0xff]  ;;  %v555_v55 = vld [vmem:[%s2220_s3 + $0x98] sm:$0xff] }
 0x13b   :  { %v461_v6 = vpop.permute.xlu1 %460  ;;  %1316 = vtanh.f32 %v507_v41  ;;  %v576_v41 = vld [vmem:[%s2220_s3 + $0x140] sm:$0xff] }
 0x13c   :  { %v1307_v26 = vpop.eup %1306  ;;  %v506_v7 = vadd.f32 %v461_v6, %v1776_v19  ;;  %809 = vmatpush.msra.mxu0 %v1305_v5  ;;  %1257 = vmatpush.msra.mxu2 %v1305_v5  ;;  %1318 = vtanh.f32 %v491_v2  ;;  %v504_v19 = vadd.f32 %v1849_v44, %v1707_v25  ;;  %v581_v2 = vld [vmem:[%s2220_s3 + $0x168] sm:$0xff] }
 0x13d   :  { %v1309_v9 = vpop.eup %1308  ;;  %900 = vmatpush.msra.mxu1 %v1307_v26  ;;  %1267 = vmatpush.msra.mxu3 %v1307_v26 }
 0x13e   :  { %v1311_v10 = vpop.eup %1310  ;;  %1320 = vtanh.f32 %v506_v7  ;;  %810 = vmatpush.msra.mxu0 %v1309_v9  ;;  %1258 = vmatpush.msra.mxu2 %v1309_v9  ;;  %v578_v7 = vld [vmem:[%s2220_s3 + $0x150] sm:$0xff]  ;;  %v557_v9 = vld [vmem:[%s2220_s3 + $0xa8] sm:$0xff] }
 0x13f   :  { %v1313_v62 = vpop.eup %1312  ;;  %1322 = vtanh.f32 %v1799_v30  ;;  %901 = vmatpush.msra.mxu1 %v1311_v10  ;;  %1268 = vmatpush.msra.mxu3 %v1311_v10  ;;  %v583_v10 = vld [vmem:[%s2220_s3 + $0x178] sm:$0xff] }
 0x140   :  { %1324 = vtanh.f32 %v505_v43  ;;  %811 = vmatpush.msra.mxu0 %v1313_v62  ;;  %1259 = vmatpush.msra.mxu2 %v1313_v62  ;;  %v1315_v37 = vpop.eup %1314  ;;  %v2067_v6 = vpop.permute.xlu2 %625  ;;  %v556_v43 = vld [vmem:[%s2220_s3 + $0xa0] sm:$0xff] }
 0x141   :  { %1326 = vtanh.f32 %v1754_v3  ;;  %1134 = vperm.xlu2 %1283, %v1024_v14   ;;  %1129 = vperm.xlu1 %1282, %v1023_v15   ;;  %v1317_v0 = vpop.eup %1316  ;;  %v1200_v3 = vld [vmem:[#allocation2] sm:$0x1]  ;;  %v2071_v26 = vpop.permute.xlu0 %630 }
 0x142   :  { %812 = vmatpush.msra.mxu0 %v1315_v37  ;;  %1260 = vmatpush.msra.mxu2 %v1315_v37  ;;  %v1319_v12 = vpop.eup %1318  ;;  %1328 = vtanh.f32 %v1802_v39  ;;  %v559_v37 = vld [vmem:[%s2220_s3 + $0xb8] sm:$0xff] }
 0x143   :  { %902 = vmatpush.msra.mxu1 %v1317_v0  ;;  %1269 = vmatpush.msra.mxu3 %v1317_v0  ;;  %1330 = vtanh.f32 %v504_v19  ;;  %v621_v5 = vpop.permute.xlu1 %620  ;;  %v580_v19 = vld [vmem:[%s2220_s3 + $0x160] sm:$0xff] }
 0x144   :  { %v1321_v30 = vpop.eup %1320  ;;  %813 = vmatpush.msra.mxu0 %v1319_v12  ;;  %1261 = vmatpush.msra.mxu2 %v1319_v12 }
 0x145   :  { %v1323_v25 = vpop.eup %1322  ;;  %903 = vmatpush.msra.mxu1 %v1321_v30  ;;  %1270 = vmatpush.msra.mxu3 %v1321_v30  ;;  %v582_v30 = vld [vmem:[%s2220_s3 + $0x170] sm:$0xff] }
 0x146   :  { %v1325_v44 = vpop.eup %1324  ;;  %814 = vmatpush.msra.mxu0 %v1323_v25  ;;  %1262 = vmatpush.msra.mxu2 %v1323_v25 }
 0x147   :  { %v1327_v17 = vpop.eup %1326  ;;  %904 = vmatpush.msra.mxu1 %v1325_v44  ;;  %1271 = vmatpush.msra.mxu3 %v1325_v44  ;;  %v561_v44 = vld [vmem:[%s2220_s3 + $0xc8] sm:$0xff]  ;;  %s1408_s3 = smov [#allocation3]  }
 0x148   :  { %815 = vmatpush.msra.mxu0 %v1327_v17  ;;  %1263 = vmatpush.msra.mxu2 %v1327_v17  ;;  %v1329_v39 = vpop.eup %1328  ;;  %v2089_v15 = vpop.permute.xlu2 %640  ;;  %s1214_s18 = sshll.u32 %s1408_s3, 4  ;;  %s1215_s18 = int_to_ptr.vmem [resolvable:$true] %s1214_s18 }
 0x149   :  { %1203 = vperm.xlu2 %1283, %v1200_v3   ;;  %1144 = vperm.xlu1 %1282, %v1026_v13   ;;  %v1331_v24 = vpop.eup %1330  ;;  %v2091_v62 = vpop.permute.xlu0 %645 }
 0x14a   :  { %816 = vmatpush.msra.mxu0 %v1329_v39  ;;  %1264 = vmatpush.msra.mxu2 %v1329_v39 }
 0x14b   :  { %905 = vmatpush.msra.mxu1 %v1331_v24  ;;  %1272 = vmatpush.msra.mxu3 %v1331_v24  ;;  %v2087_v14 = vpop.permute.xlu1 %635 }
 0x14c   :  { %817 = vmatmul.f32.vlgmr.msra.gmra.mxu0 %v536_v18  ;;  %850 = vmatmul.f32.vlgmr.msra.gmra.mxu2 %v558_v21 }
 0x14d   :  { %1225 = vmatmul.msk.f32.vlgmr.msra.gmra.mxu1 %vm728_vm0, %v537_v27  ;;  %1238 = vmatmul.msk.f32.vlgmr.msra.gmra.mxu3 %vm728_vm0, %v563_v8 }
 0x150   :  { %v2102_v12 = vpop.permute.xlu2 %655 }
 0x151   :  { %v2107_v25 = vpop.permute.xlu0 %660 }
 0x153   :  { %v2100_v0 = vpop.permute.xlu1 %650 }
 0x154   :  { %820 = vmatmul.f32.gmra.mxu0 %v538_v32  ;;  %853 = vmatmul.f32.gmra.mxu2 %v560_v33 }
 0x155   :  { %1226 = vmatmul.msk.f32.gmra.mxu1 %vm728_vm0, %v539_v38  ;;  %1239 = vmatmul.msk.f32.gmra.mxu3 %vm728_vm0, %v565_v40 }
 0x158   :  { %v2115_v13 = vpop.permute.xlu2 %670 }
 0x159   :  { %v2117_v17 = vpop.permute.xlu0 %675 }
 0x15b   :  { %v2113_v3 = vpop.permute.xlu1 %665 }
 0x15c   :  { %823 = vmatmul.f32.gmra.mxu0 %v540_v42  ;;  %856 = vmatmul.f32.gmra.mxu2 %v562_v47 }
 0x15d   :  { %1227 = vmatmul.msk.f32.gmra.mxu1 %vm728_vm0, %v541_v60  ;;  %1240 = vmatmul.msk.f32.gmra.mxu3 %vm728_vm0, %v567_v11 }
 0x160   :  { %v2121_v18 = vpop.permute.xlu2 %685 }
 0x161   :  { %v2123_v21 = vpop.permute.xlu0 %690 }
 0x163   :  { %v2119_v39 = vpop.permute.xlu1 %680 }
 0x164   :  { %826 = vmatmul.f32.gmra.mxu0 %v542_v4  ;;  %859 = vmatmul.f32.gmra.mxu2 %v564_v20 }
 0x165   :  { %1228 = vmatmul.msk.f32.gmra.mxu1 %vm728_vm0, %v543_v46  ;;  %1241 = vmatmul.msk.f32.gmra.mxu3 %vm728_vm0, %v569_v51 }
 0x168   :  { %v2127_v27 = vpop.permute.xlu2 %700 }
 0x169   :  { %v2129_v8 = vpop.permute.xlu0 %705 }
 0x16b   :  { %v2125_v24 = vpop.permute.xlu1 %695 }
 0x16c   :  { %829 = vmatmul.f32.gmra.mxu0 %v544_v31  ;;  %862 = vmatmul.f32.gmra.mxu2 %v566_v59 }
 0x16d   :  { %1229 = vmatmul.msk.f32.gmra.mxu1 %vm728_vm0, %v545_v58  ;;  %1242 = vmatmul.msk.f32.gmra.mxu3 %vm728_vm0, %v571_v48 }
 0x170   :  { %v2135_v60 = vpop.permute.xlu2 %715 }
 0x171   :  { %v2137_v4 = vpop.permute.xlu0 %720 }
 0x173   :  { %v2133_v47 = vpop.permute.xlu1 %710 }
 0x174   :  { %832 = vmatmul.f32.gmra.mxu0 %v546_v52  ;;  %865 = vmatmul.f32.gmra.mxu2 %v568_v49 }
 0x175   :  { %1230 = vmatmul.msk.f32.gmra.mxu1 %vm728_vm0, %v547_v36  ;;  %1243 = vmatmul.msk.f32.gmra.mxu3 %vm728_vm0, %v573_v53 }
 0x17b   :  { %v2143_v52 = vpop.permute.xlu1 %725 }
 0x17c   :  { %835 = vmatmul.f32.gmra.mxu0 %v548_v54  ;;  %868 = vmatmul.f32.gmra.mxu2 %v570_v56  ;;  %v1030_v54 = vpop.permute.xlu2 %1029  ;;  %v1035_v56 = vpop.permute.xlu0 %1034 }
 0x17d   :  { %1231 = vmatmul.msk.f32.gmra.mxu1 %vm728_vm0, %v549_v34  ;;  %1244 = vmatmul.msk.f32.gmra.mxu3 %vm728_vm0, %v575_v35 }
 0x184   :  { %838 = vmatmul.f32.gmra.mxu0 %v550_v22  ;;  %871 = vmatmul.f32.gmra.mxu2 %v572_v29 }
 0x185   :  { %1232 = vmatmul.msk.f32.gmra.mxu1 %vm728_vm0, %v551_v57  ;;  %1245 = vmatmul.msk.f32.gmra.mxu3 %vm728_vm0, %v577_v50 }
 0x18c   :  { %841 = vmatmul.f32.gmra.mxu0 %v552_v61  ;;  %874 = vmatmul.f32.gmra.mxu2 %v574_v23 }
 0x18d   :  { %1233 = vmatmul.msk.f32.gmra.mxu1 %vm728_vm0, %v553_v63  ;;  %1246 = vmatmul.msk.f32.gmra.mxu3 %vm728_vm0, %v579_v45 }
 0x194   :  { %844 = vmatmul.f32.gmra.mxu0 %v554_v28  ;;  %877 = vmatmul.f32.gmra.mxu2 %v576_v41 }
 0x195   :  { %1234 = vmatmul.msk.f32.gmra.mxu1 %vm728_vm0, %v555_v55  ;;  %1247 = vmatmul.msk.f32.gmra.mxu3 %vm728_vm0, %v581_v2 }
 0x19c   :  { %847 = vmatmul.f32.gmra.mxu0 %v556_v43  ;;  %880 = vmatmul.f32.gmra.mxu2 %v578_v7 }
 0x19d   :  { %1235 = vmatmul.msk.f32.gmra.mxu1 %vm728_vm0, %v557_v9  ;;  %1248 = vmatmul.msk.f32.gmra.mxu3 %vm728_vm0, %v583_v10  ;;  %v1045_v10 = vpop.permute.xlu2 %1044 }
 0x1a4   :  { %883 = vmatmul.f32.gmra.mxu2 %v580_v19 }
 0x1a5   :  { %1236 = vmatmul.msk.f32.gmra.mxu1 %vm728_vm0, %v559_v37 }
 0x1ac   :  { %886 = vmatmul.f32.gmra.mxu2 %v582_v30 }
 0x1ad   :  { %1237 = vmatmul.msk.f32.gmra.mxu1 %vm728_vm0, %v561_v44 }
 0x1c9   :  { %v818_v32 = vpop.f32.mrf.mxu0 }
 0x1ca   :  { %v819_v33 = vadd.f32 %v818_v32, %v611_v16  ;;  %v907_v38 = vpop.f32.mrf.mxu1  ;;  %v1040_v16 = vpop.permute.xlu1 %1039 }
 0x1cc   :  { %v908_v40 = vadd.f32 %v907_v38, %v819_v33 }
 0x1ce   :  { %1332 = vtanh.f32 %v908_v40  ;;  %v1050_v40 = vpop.permute.xlu0 %1049 }
 0x1cf   :  { %v2131_v42 = vpop.f32.mrf.mxu2 }
 0x1d0   :  { %v2139_v31 = vpop.f32.mrf.mxu3 }
 0x1d1   :  { %v821_v11 = vpop.f32.mrf.mxu0 }
 0x1d2   :  { %v822_v20 = vadd.f32 %v821_v11, %v616_v1  ;;  %v910_v46 = vpop.f32.mrf.mxu1 }
 0x1d4   :  { %v911_v51 = vadd.f32 %v910_v46, %v822_v20  ;;  %v1333_v48 = vpop.eup %1332 }
 0x1d5   :  { %v1147_v35 = vmul.f32 %v1333_v48, %v1030_v54 }
 0x1d6   :  { %1334 = vtanh.f32 %v911_v51 }
 0x1d7   :  { %v2141_v59 = vpop.f32.mrf.mxu2 }
 0x1d8   :  { %v2147_v50 = vpop.f32.mrf.mxu3 }
 0x1d9   :  { %v824_v58 = vpop.f32.mrf.mxu0 }
 0x1da   :  { %v825_v49 = vadd.f32 %v824_v58, %v621_v5  ;;  %v913_v36 = vpop.f32.mrf.mxu1 }
 0x1dc   :  { %v1335_v53 = vpop.eup %1334  ;;  %v914_v34 = vadd.f32 %v913_v36, %v825_v49  ;;  %v1055_v36 = vpop.permute.xlu1 %1054 }
 0x1dd   :  { %v1148_v22 = vmul.f32 %v1335_v53, %v1035_v56 }
 0x1de   :  { %1336 = vtanh.f32 %v914_v34 }
 0x1df   :  { %v1171_v29 = vadd.f32 %v1148_v22, %v1147_v35  ;;  %v2145_v57 = vpop.f32.mrf.mxu2 }
 0x1e0   :  { %v2153_v7 = vpop.f32.mrf.mxu3 }
 0x1e1   :  { %v827_v61 = vpop.f32.mrf.mxu0 }
 0x1e2   :  { %v828_v23 = vadd.f32 %v827_v61, %v2067_v6  ;;  %v916_v63 = vpop.f32.mrf.mxu1 }
 0x1e4   :  { %v1337_v45 = vpop.eup %1336  ;;  %v917_v1 = vadd.f32 %v916_v63, %v828_v23 }
 0x1e5   :  { %v1149_v28 = vmul.f32 %v1337_v45, %v1040_v16 }
 0x1e6   :  { %1338 = vtanh.f32 %v917_v1 }
 0x1e7   :  { %v1172_v41 = vadd.f32 %v1171_v29, %v1149_v28  ;;  %v2150_v55 = vpop.f32.mrf.mxu2 }
 0x1e8   :  { %v2158_v20 = vpop.f32.mrf.mxu3 }
 0x1e9   :  { %v830_v2 = vpop.f32.mrf.mxu0 }
 0x1ea   :  { %v831_v5 = vadd.f32 %v830_v2, %v2071_v26  ;;  %v919_v43 = vpop.f32.mrf.mxu1  ;;  %v1060_v2 = vpop.permute.xlu2 %1059 }
 0x1ec   :  { %v1339_v9 = vpop.eup %1338  ;;  %v920_v19 = vadd.f32 %v919_v43, %v831_v5 }
 0x1ed   :  { %v1150_v37 = vmul.f32 %v1339_v9, %v1045_v10  ;;  %v1065_v9 = vpop.permute.xlu0 %1064 }
 0x1ee   :  { %1340 = vtanh.f32 %v920_v19 }
 0x1ef   :  { %v1173_v6 = vadd.f32 %v1172_v41, %v1150_v37  ;;  %v2155_v30 = vpop.f32.mrf.mxu2  ;;  %v1070_v37 = vpop.permute.xlu1 %1069 }
 0x1f0   :  { %v2162_v54 = vpop.f32.mrf.mxu3 }
 0x1f1   :  { %v833_v44 = vpop.f32.mrf.mxu0 }
 0x1f2   :  { %v834_v32 = vadd.f32 %v833_v44, %v2087_v14  ;;  %v922_v33 = vpop.f32.mrf.mxu1 }
 0x1f4   :  { %v1341_v38 = vpop.eup %1340  ;;  %v923_v11 = vadd.f32 %v922_v33, %v834_v32 }
 0x1f5   :  { %v1151_v26 = vmul.f32 %v1341_v38, %v1050_v40 }
 0x1f6   :  { %1342 = vtanh.f32 %v923_v11  ;;  %v1075_v11 = vpop.permute.xlu2 %1074 }
 0x1f7   :  { %v1174_v46 = vadd.f32 %v1173_v6, %v1151_v26  ;;  %v2160_v51 = vpop.f32.mrf.mxu2 }
 0x1f8   :  { %v2168_v29 = vpop.f32.mrf.mxu3 }
 0x1f9   :  { %v836_v58 = vpop.f32.mrf.mxu0 }
 0x1fa   :  { %v925_v48 = vpop.f32.mrf.mxu1  ;;  %v837_v63 = vadd.f32 %v836_v58, %v2089_v15 }
 0x1fc   :  { %v1343_v49 = vpop.eup %1342  ;;  %v926_v5 = vadd.f32 %v925_v48, %v837_v63  ;;  %v1085_v48 = vpop.permute.xlu1 %1084 }
 0x1fd   :  { %v1152_v53 = vmul.f32 %v1343_v49, %v1055_v36  ;;  %v852_v49 = vadd.f32 %v2131_v42, %v2113_v3 }
 0x1fe   :  { %1344 = vtanh.f32 %v926_v5  ;;  %v1090_v5 = vpop.permute.xlu2 %1089 }
 0x1ff   :  { %v1175_v56 = vadd.f32 %v1174_v46, %v1152_v53  ;;  %v2164_v14 = vpop.f32.mrf.mxu2 }
 0x200   :  { %v2174_v41 = vpop.f32.mrf.mxu3 }
 0x201   :  { %v839_v34 = vpop.f32.mrf.mxu0 }
 0x202   :  { %v928_v35 = vpop.f32.mrf.mxu1  ;;  %v840_v16 = vadd.f32 %v839_v34, %v2091_v62 }
 0x204   :  { %v929_v10 = vadd.f32 %v928_v35, %v840_v16 }
 0x206   :  { %1346 = vtanh.f32 %v929_v10 }
 0x207   :  { %v2166_v22 = vpop.f32.mrf.mxu2 }
 0x208   :  { %v2181_v40 = vpop.f32.mrf.mxu3 }
 0x209   :  { %v842_v61 = vpop.f32.mrf.mxu0 }
 0x20a   :  { %v931_v23 = vpop.f32.mrf.mxu1  ;;  %v843_v43 = vadd.f32 %v842_v61, %v2100_v0  ;;  %v1345_v0 = vpop.eup %1344  ;;  %v858_v61 = vadd.f32 %v2145_v57, %v2117_v17  ;;  %v864_v17 = vadd.f32 %v2155_v30, %v2121_v18 }
 0x20b   :  { %v1153_v46 = vmul.f32 %v1345_v0, %v1060_v2 }
 0x20c   :  { %v932_v6 = vadd.f32 %v931_v23, %v843_v43  ;;  %v1347_v26 = vpop.eup %1346  ;;  %v861_v43 = vadd.f32 %v2150_v55, %v2119_v39  ;;  %v947_v3 = vadd.f32 %v2139_v31, %v858_v61  ;;  %v867_v39 = vadd.f32 %v2160_v51, %v2123_v21  ;;  %v1105_v21 = vpop.permute.xlu2 %1104 }
 0x20d   :  { %v1154_v36 = vmul.f32 %v1347_v26, %v1065_v9  ;;  %v1176_v23 = vadd.f32 %v1175_v56, %v1153_v46 }
 0x20e   :  { %1348 = vtanh.f32 %v932_v6  ;;  %v1100_v6 = vpop.permute.xlu1 %1099 }
 0x20f   :  { %v2171_v45 = vpop.f32.mrf.mxu2 }
 0x210   :  { %v970_v2 = vpop.f32.mrf.mxu3 }
 0x211   :  { %v845_v1 = vpop.f32.mrf.mxu0 }
 0x212   :  { %v934_v28 = vpop.f32.mrf.mxu1  ;;  %v846_v19 = vadd.f32 %v845_v1, %v2102_v12  ;;  %v1080_v12 = vpop.permute.xlu0 %1079  ;;  %v1177_v1 = vadd.f32 %v1176_v23, %v1154_v36 }
 0x214   :  { %v935_v44 = vadd.f32 %v934_v28, %v846_v19  ;;  %v1349_v58 = vpop.eup %1348  ;;  %v855_v19 = vadd.f32 %v2141_v59, %v2115_v13  ;;  %v870_v13 = vadd.f32 %v2164_v14, %v2125_v24  ;;  %v956_v59 = vadd.f32 %v2158_v20, %v867_v39 }
 0x215   :  { %v1155_v63 = vmul.f32 %v1349_v58, %v1070_v37 }
 0x216   :  { %1350 = vtanh.f32 %v935_v44  ;;  %v950_v44 = vadd.f32 %v2147_v50, %v861_v43  ;;  %v873_v50 = vadd.f32 %v2166_v22, %v2127_v27  ;;  %v959_v51 = vadd.f32 %v2162_v54, %v870_v13  ;;  %v1115_v27 = vpop.permute.xlu1 %1114 }
 0x217   :  { %v2178_v15 = vpop.f32.mrf.mxu2  ;;  %v1178_v42 = vadd.f32 %v1177_v1, %v1155_v63 }
 0x218   :  { %v973_v30 = vpop.f32.mrf.mxu3  ;;  %v962_v24 = vadd.f32 %v2168_v29, %v873_v50  ;;  %v879_v20 = vadd.f32 %v2178_v15, %v2133_v47 }
 0x219   :  { %v848_v62 = vpop.f32.mrf.mxu0 }
 0x21a   :  { %v849_v32 = vadd.f32 %v848_v62, %v2107_v25  ;;  %v937_v33 = vpop.f32.mrf.mxu1  ;;  %v1095_v10 = vpop.permute.xlu0 %1094  ;;  %v968_v58 = vadd.f32 %v2181_v40, %v879_v20 }
 0x21c   :  { %v938_v38 = vadd.f32 %v937_v33, %v849_v32  ;;  %v1351_v34 = vpop.eup %1350  ;;  %v953_v33 = vadd.f32 %v2153_v7, %v864_v17 }
 0x21d   :  { %v1156_v28 = vmul.f32 %v1351_v34, %v1075_v11 }
 0x21e   :  { %1352 = vtanh.f32 %v938_v38  ;;  %v876_v38 = vadd.f32 %v2171_v45, %v2129_v8 }
 0x21f   :  { %v881_v53 = vpop.f32.mrf.mxu2  ;;  %v1179_v57 = vadd.f32 %v1178_v42, %v1156_v28 }
 0x220   :  { %v965_v22 = vadd.f32 %v2174_v41, %v876_v38  ;;  %v882_v54 = vadd.f32 %v881_v53, %v2135_v60  ;;  %v976_v34 = vpop.f32.mrf.mxu3  ;;  %v1120_v53 = vpop.permute.xlu2 %1119 }
 0x222   :  { %v940_v25 = vpop.f32.mrf.mxu1  ;;  %v1110_v11 = vpop.permute.xlu0 %1109  ;;  %v971_v15 = vadd.f32 %v970_v2, %v882_v54 }
 0x223   :  { %v941_v35 = vadd.f32 %v940_v25, %v852_v49 }
 0x224   :  { %v1353_v16 = vpop.eup %1352 }
 0x225   :  { %1354 = vtanh.f32 %v941_v35  ;;  %v1157_v9 = vmul.f32 %v1353_v16, %v1080_v12 }
 0x226   :  { %1356 = vtanh.f32 %v947_v3 }
 0x227   :  { %v1180_v31 = vadd.f32 %v1179_v57, %v1157_v9  ;;  %v884_v32 = vpop.f32.mrf.mxu2 }
 0x228   :  { %v885_v29 = vadd.f32 %v884_v32, %v2137_v4  ;;  %v1135_v57 = vpop.permute.xlu2 %1134 }
 0x22a   :  { %v943_v56 = vpop.f32.mrf.mxu1  ;;  %v974_v35 = vadd.f32 %v973_v30, %v885_v29  ;;  %v1125_v40 = vpop.permute.xlu0 %1124 }
 0x22b   :  { %v1355_v37 = vpop.eup %1354  ;;  %v944_v55 = vadd.f32 %v943_v56, %v855_v19 }
 0x22c   :  { %v1158_v62 = vmul.f32 %v1355_v37, %v1085_v48  ;;  %v1357_v7 = vpop.eup %1356 }
 0x22d   :  { %1358 = vtanh.f32 %v944_v55  ;;  %v1160_v12 = vmul.f32 %v1357_v7, %v1095_v10 }
 0x22e   :  { %v1181_v18 = vadd.f32 %v1180_v31, %v1158_v62  ;;  %1360 = vtanh.f32 %v950_v44 }
 0x22f   :  { %1362 = vtanh.f32 %v953_v33  ;;  %v887_v8 = vpop.f32.mrf.mxu2 }
 0x230   :  { %1364 = vtanh.f32 %v956_v59  ;;  %v888_v36 = vadd.f32 %v887_v8, %v2143_v52  ;;  %v1204_v30 = vpop.permute.xlu2 %1203 }
 0x231   :  { %1366 = vtanh.f32 %v959_v51  ;;  %v1206_v51 = vperm.slane %v1204_v30, 0 }
 0x232   :  { %1368 = vtanh.f32 %v962_v24  ;;  %v977_v4 = vadd.f32 %v976_v34, %v888_v36  ;;  %v1140_v44 = vpop.permute.xlu0 %1139 }
 0x233   :  { %v1359_v0 = vpop.eup %1358  ;;  %1370 = vtanh.f32 %v965_v22 }
 0x234   :  { %v1159_v14 = vmul.f32 %v1359_v0, %v1090_v5  ;;  %v1361_v26 = vpop.eup %1360  ;;  %1372 = vtanh.f32 %v968_v58  ;;  %v1130_v5 = vpop.permute.xlu1 %1129 }
 0x235   :  { %v1363_v45 = vpop.eup %1362  ;;  %v1161_v48 = vmul.f32 %v1361_v26, %v1100_v6  ;;  %1374 = vtanh.f32 %v971_v15 }
 0x236   :  { %v1182_v46 = vadd.f32 %v1181_v18, %v1159_v14  ;;  %v1365_v47 = vpop.eup %1364  ;;  %v1162_v25 = vmul.f32 %v1363_v45, %v1105_v21  ;;  %1376 = vtanh.f32 %v974_v35 }
 0x237   :  { %v1367_v60 = vpop.eup %1366  ;;  %v1163_v61 = vmul.f32 %v1365_v47, %v1110_v11  ;;  %1378 = vtanh.f32 %v977_v4 }
 0x238   :  { %v1183_v49 = vadd.f32 %v1182_v46, %v1160_v12  ;;  %v1369_v63 = vpop.eup %1368  ;;  %v1164_v16 = vmul.f32 %v1367_v60, %v1115_v27 }
 0x239   :  { %v1371_v28 = vpop.eup %1370  ;;  %v1165_v2 = vmul.f32 %v1369_v63, %v1120_v53 }
 0x23a   :  { %v1184_v41 = vadd.f32 %v1183_v49, %v1161_v48  ;;  %v1373_v43 = vpop.eup %1372  ;;  %v1166_v3 = vmul.f32 %v1371_v28, %v1125_v40 }
 0x23b   :  { %v1375_v9 = vpop.eup %1374  ;;  %v1167_v10 = vmul.f32 %v1373_v43, %v1130_v5 }
 0x23c   :  { %v1185_v23 = vadd.f32 %v1184_v41, %v1162_v25  ;;  %v1377_v17 = vpop.eup %1376  ;;  %v1168_v56 = vmul.f32 %v1375_v9, %v1135_v57  ;;  %v1145_v31 = vpop.permute.xlu1 %1144 }
 0x23d   :  { %v1379_v6 = vpop.eup %1378  ;;  %v1169_v39 = vmul.f32 %v1377_v17, %v1140_v44 }
 0x23e   :  { %v1186_v1 = vadd.f32 %v1185_v23, %v1163_v61  ;;  %v1170_v32 = vmul.f32 %v1379_v6, %v1145_v31 }
 0x240   :  { %v1187_v52 = vadd.f32 %v1186_v1, %v1164_v16 }
 0x242   :  { %v1188_v42 = vadd.f32 %v1187_v52, %v1165_v2 }
 0x244   :  { %v1189_v19 = vadd.f32 %v1188_v42, %v1166_v3 }
 0x246   :  { %v1190_v37 = vadd.f32 %v1189_v19, %v1167_v10 }
 0x248   :  { %v1191_v55 = vadd.f32 %v1190_v37, %v1168_v56 }
 0x24a   :  { %v1192_v62 = vadd.f32 %v1191_v55, %v1169_v39 }
 0x24c   :  { %v1193_v33 = vadd.f32 %v1192_v62, %v1170_v32 }
 0x24e   :  { %v1194_v13 = vrot.slane %v1193_v33, 4 }
 0x250   :  { %v1195_v18 = vadd.f32 %v1194_v13, %v1193_v33 }
 0x252   :  { %v1196_v59 = vrot.slane %v1195_v18, 2 }
 0x254   :  { %v1197_v50 = vadd.f32 %v1196_v59, %v1195_v18 }
 0x256   :  { %v1198_v21 = vrot.slane %v1197_v50, 1 }
 0x258   :  { %v1199_v38 = vadd.f32 %v1198_v21, %v1197_v50 }
 0x25a   :  { %v1207_v7 = vadd.f32 %v1206_v51, %v1199_v38 }
 0x25c   :  { %1208 = vst [vmem:[#allocation3] sm:$0x1] %v1207_v7 }
 0x25d   :  { %1219 = dma.vmem_to_hbm [thread:$0]  %s1215_s18, 16, %s1217_s21, [#allocation4]  }
 0x25e   :  { %1404 = dma.done.wait [#allocation4], 16  }
 0x25f   :  { %1405 = vsyncadd [#allocation4], 4294967280 }
 0x260   :  { %1224 = vsyncpa [#allocation4], 1 }

</bundles_post_ra>
